<compile_context>
chip_gen: v7x
topology: tpu7x:2x2x1
jax: 0.10.0
libtpu: 0.0.40
codegen_flags: <defaults>
</compile_context>

<pallas_src>
import functools

import jax
import jax.numpy as jnp
from jax import lax
from jax.experimental import pallas as pl
from jax.experimental.pallas import tpu as pltpu


def _cdiv(a, b):
    return -(-a // b)


def _round_up(a, b):
    return _cdiv(a, b) * b


def _global_attention_kernel(Bb, Tp, mm_dtype, approx_recip,
                             len_ref, ht_ref, src_ref, w_ref, out_ref):
    """One grid step = Bb batch elements.

    len_ref : SMEM int32 (Bp,)      scalar-prefetched src_lengths (0 for padded rows)
    ht_ref  : VMEM (Bb*Tp, D)       decoder states, batch/time flattened (mm_dtype)
    src_ref : VMEM (Bb, S, E)       encoder states (mm_dtype)
    w_ref   : VMEM (D, E)           Wa.weight in its native layout (shared across grid)
    out_ref : VMEM (Bb*Tp, E)       context vectors (float32)
    """
    S = src_ref.shape[1]
    E = src_ref.shape[2]
    bstart = pl.program_id(0) * Bb

    ht = ht_ref[...]                # (Bb*Tp, D) mm_dtype
    src = src_ref[...]              # (Bb, S, E) mm_dtype
    w = w_ref[...]                  # (D, E)     mm_dtype

    # 1) Fused projection: ONE MXU matmul over all Bb*Tp rows (W pushed once per block).
    q = lax.dot_general(ht, w, (((1,), (0,)), ((), ())),
                        preferred_element_type=jnp.float32)             # (Bb*Tp, E) f32
    # Tp is a sublane-tile multiple, so this leading-dim split is layout-preserving.
    q3 = q.reshape(Bb, Tp, E).astype(mm_dtype)                          # (Bb, Tp, E)

    # 2) Scores, batched over Bb: contract the E axes directly ('bte,bse->bts').
    s = lax.dot_general(q3, src, (((2,), (2,)), ((0,), (0,))),
                        preferred_element_type=jnp.float32)             # (Bb, Tp, S) f32

    # 3) Masked, max-stabilised softmax over S on the whole block at once
    #    (mathematically identical to exp(s)*mask / sum_S(exp(s)*mask)).
    pos = lax.broadcasted_iota(jnp.int32, (Bb, Tp, S), 2)
    lens_b = jnp.concatenate(
        [jnp.full((1, Tp, 1), len_ref[bstart + i], jnp.int32) for i in range(Bb)],
        axis=0)                                                          # (Bb, Tp, 1)
    valid = pos < lens_b                                                 # (Bb, Tp, S)
    s_masked = jnp.where(valid, s, -jnp.inf)
    m = jnp.max(s_masked, axis=-1, keepdims=True)                        # (Bb, Tp, 1)
    p = jnp.where(valid, jnp.exp(s - m), 0.0)                            # (Bb, Tp, S) f32
    denom = jnp.sum(p, axis=-1, keepdims=True)                           # (Bb, Tp, 1)
    # One reciprocal per row, folded into the final scale; length==0 rows give 0, not NaN.
    inv = pl.reciprocal(jnp.maximum(denom, 1e-30), approx=approx_recip)

    # 4) Context, batched over Bb: 'bts,bse->bte'.
    ctx = lax.dot_general(p.astype(mm_dtype), src, (((2,), (1,)), ((0,), (0,))),
                          preferred_element_type=jnp.float32)            # (Bb, Tp, E) f32
    ctx = ctx * inv

    # 5) One lane-dense store of the whole block.
    out_ref[...] = ctx.reshape(Bb * Tp, E).astype(out_ref.dtype)


def _vmem_capacity_bytes():
    try:
        cap = getattr(pltpu.get_tpu_info(), "vmem_capacity_bytes", None)
        if cap:
            return int(cap)
    except Exception:
        pass
    return 64 * 1024 * 1024      # conservative fallback = v7x per-core VMEM


def _choose_block_b(B, S, Tp, D, E, mm_itemsize, vmem_cap, max_block_b):
    """Largest batch block whose double-buffered pipeline tiles fit in ~half of VMEM
    (generation-aware via vmem_cap), then shrunk so the 'parallel' batch axis has >= 2
    grid steps (v7x has 2 TensorCores)."""
    def dbuf_bytes(bb):
        ht = bb * Tp * D * mm_itemsize
        src = bb * S * E * mm_itemsize
        out = bb * Tp * E * 4
        w = D * E * mm_itemsize
        return 2 * (ht + src + out + w)          # 2x: double-buffered pipeline copies

    bb = max(1, min(max_block_b, B))
    while bb > 1 and dbuf_bytes(bb) > vmem_cap // 2:
        bb -= 1
    if B >= 2 and _cdiv(B, bb) < 2:
        bb = _cdiv(B, 2)
    return bb


def global_attention_general(h_t, src_encodings, wa_weight, src_lengths, *,
                             matmul_dtype=jnp.float32, max_block_b=8):
    """Pallas TPU implementation of GlobalAttention(attn_type='General', mask_attn=True).

    h_t:           (T, B, D) f32   decoder states
    src_encodings: (S, B, E) f32   encoder states
    wa_weight:     (D, E)    f32   nn.Linear(E, D, bias=False).weight
    src_lengths:   (B,)      int   valid source lengths
    returns:       (T, B, E) f32   context vectors

    matmul_dtype=jnp.bfloat16 runs the three matmuls on the bf16 MXU path (f32 accumulation,
    f32 softmax) and halves HBM->VMEM bytes; recommended on v6e/v7x.  The float32 default
    preserves the module's exact f32 semantics.
    """
    T, B, D = h_t.shape
    S, _, E = src_encodings.shape
    assert wa_weight.shape == (D, E)

    mm = jnp.dtype(matmul_dtype)
    approx_recip = bool(mm != jnp.dtype(jnp.float32))
    sublane = {4: 8, 2: 16, 1: 32}.get(mm.itemsize, 8)
    Tp = _round_up(T, sublane)          # pad T so all blocks / reshapes are tile-aligned

    vmem_cap = _vmem_capacity_bytes()
    Bb = _choose_block_b(B, S, Tp, D, E, mm.itemsize, vmem_cap, max_block_b)
    Bp = _round_up(B, Bb)

    # Batch-first layout + matmul-dtype cast, done once outside the kernel.
    src_bf = jnp.transpose(src_encodings, (1, 0, 2)).astype(mm)         # (B, S, E)
    ht_bf = jnp.transpose(h_t, (1, 0, 2)).astype(mm)                    # (B, T, D)
    w = wa_weight.astype(mm)
    lens = src_lengths.astype(jnp.int32)

    if Bp != B or Tp != T:
        src_bf = jnp.pad(src_bf, ((0, Bp - B), (0, 0), (0, 0)))
        ht_bf = jnp.pad(ht_bf, ((0, Bp - B), (0, Tp - T), (0, 0)))
        lens = jnp.pad(lens, (0, Bp - B))       # padded batch rows: length 0 -> context 0
    ht_2d = ht_bf.reshape(Bp * Tp, D)           # free reshape (merges contiguous leading dims)

    # VMEM limit from the actual footprint (+ headroom), capped below physical capacity.
    dbuf = 2 * (Bb * Tp * D * mm.itemsize + Bb * S * E * mm.itemsize
                + Bb * Tp * E * 4 + D * E * mm.itemsize)
    live = Bb * Tp * (2 * E * 4 + 3 * S * 4)    # q, ctx, s, p, mask live values (f32-ish)
    vmem_limit = min(int(vmem_cap * 0.9),
                     max(16 * 1024 * 1024, int(1.5 * (dbuf + live))))

    kernel = functools.partial(_global_attention_kernel, Bb, Tp, mm, approx_recip)

    grid_spec = pltpu.PrefetchScalarGridSpec(
        num_scalar_prefetch=1,
        grid=(Bp // Bb,),
        in_specs=[
            pl.BlockSpec((Bb * Tp, D), lambda g, lens: (g, 0)),
            pl.BlockSpec((Bb, S, E), lambda g, lens: (g, 0, 0)),
            pl.BlockSpec((D, E), lambda g, lens: (0, 0)),
        ],
        out_specs=pl.BlockSpec((Bb * Tp, E), lambda g, lens: (g, 0)),
    )

    out_2d = pl.pallas_call(
        kernel,
        out_shape=jax.ShapeDtypeStruct((Bp * Tp, E), jnp.float32),
        grid_spec=grid_spec,
        compiler_params=pltpu.CompilerParams(
            dimension_semantics=("parallel",),    # independent batch blocks; v7x splits them
            vmem_limit_bytes=vmem_limit,
        ),
    )(lens, ht_2d, src_bf, w)

    out = out_2d.reshape(Bp, Tp, E)[:B, :T]
    return jnp.transpose(out, (1, 0, 2))          # back to PyTorch (T, B, E) convention


def _reference_forward(h_t, src_encodings, wa_weight, src_lengths):
    """Pure-JAX transcription of the PyTorch forward (attn_type='General', mask_attn=True)."""
    S, B, E = src_encodings.shape
    Wahs = jnp.einsum('sbe,de->sbd', src_encodings, wa_weight)          # (S, B, D)
    scores = jnp.einsum('sbd,tbd->stb', Wahs, h_t)[..., None]           # (S, T, B, 1)
    mask = (jnp.arange(S)[:, None] < src_lengths[None, :]).astype(src_encodings.dtype)
    mask = mask[:, None, :, None]                                       # (S, 1, B, 1)
    e = jnp.exp(scores) * mask
    attn = e / jnp.sum(e, axis=0, keepdims=True)                        # (S, T, B, 1)
    expand_src = jnp.broadcast_to(src_encodings[:, None], (S, h_t.shape[0], B, E))
    return (attn * expand_src).sum(axis=0)                              # (T, B, E)


if __name__ == "__main__":
    # Small shapes consistent with the module's forward.
    T = 4    # target length
    S = 8    # source length
    B = 2    # batch
    E = 32   # encoder_hidden_size
    D = 32   # decoder_hidden_size

    key = jax.random.PRNGKey(0)
    k1, k2, k3 = jax.random.split(key, 3)
    h_t = jax.random.normal(k1, (T, B, D), dtype=jnp.float32)
    src_encodings = jax.random.normal(k2, (S, B, E), dtype=jnp.float32)
    wa_weight = jax.random.normal(k3, (D, E), dtype=jnp.float32) * 0.1  # nn.Linear(E, D).weight
    src_lengths = jnp.array([8, 5], dtype=jnp.int32)

    ref = _reference_forward(h_t, src_encodings, wa_weight, src_lengths)

    # Exact f32 path (matches the module's float32 semantics).
    context = global_attention_general(h_t, src_encodings, wa_weight, src_lengths)
    context = jax.block_until_ready(context)
    assert context.shape == (T, B, E)
    assert jnp.allclose(context, ref, atol=1e-4, rtol=1e-4), "f32 mismatch vs reference"

    # bf16 MXU path (perf default recommendation for v6e/v7x); looser tolerance.
    context_bf16 = jax.block_until_ready(
        global_attention_general(h_t, src_encodings, wa_weight, src_lengths,
                                 matmul_dtype=jnp.bfloat16))
    assert context_bf16.shape == (T, B, E)
    assert bool(jnp.all(jnp.isfinite(context_bf16)))
    assert jnp.allclose(context_bf16, ref, atol=0.15, rtol=0.15), "bf16 mismatch vs reference"

    print("KERNEL_OK")
</pallas_src>

<mosaic_0001>
module attributes {stable_mosaic.version = 11 : i64} {
  func.func @_global_attention_kernel(%arg0: i32, %arg1: memref<2xi32, #tpu.memory_space<smem>>, %arg2: memref<8x32xf32, #tpu.memory_space<vmem>>, %arg3: memref<1x8x32xf32, #tpu.memory_space<vmem>>, %arg4: memref<32x32xf32, #tpu.memory_space<vmem>>, %arg5: memref<8x32xf32, #tpu.memory_space<vmem>>) attributes {dimension_semantics = [#tpu.dimension_semantics<parallel>], iteration_bounds = array<i64: 2>, scalar_prefetch = 1 : i64, scratch_operands = 0 : i64, tpu.core_type = #tpu.core_type<tc>, window_params = [{transform_indices = @transform_0, window_bounds = array<i64: 8, 32>}, {transform_indices = @transform_1, window_bounds = array<i64: 1, 8, 32>}, {pipeline_mode = #tpu.pipeline_mode<synchronous>, transform_indices = @transform_2, window_bounds = array<i64: 32, 32>}, {transform_indices = @transform_3, window_bounds = array<i64: 8, 32>}]} {
    %c1_i32 = arith.constant 1 : i32
    %0 = arith.muli %arg0, %c1_i32 : i32
    %c0 = arith.constant 0 : index
    %c0_0 = arith.constant 0 : index
    %1 = vector.load %arg2[%c0, %c0_0] : memref<8x32xf32, #tpu.memory_space<vmem>>, vector<8x32xf32>
    %c0_1 = arith.constant 0 : index
    %c0_2 = arith.constant 0 : index
    %c0_3 = arith.constant 0 : index
    %2 = vector.load %arg3[%c0_1, %c0_2, %c0_3] : memref<1x8x32xf32, #tpu.memory_space<vmem>>, vector<1x8x32xf32>
    %c0_4 = arith.constant 0 : index
    %c0_5 = arith.constant 0 : index
    %3 = vector.load %arg4[%c0_4, %c0_5] : memref<32x32xf32, #tpu.memory_space<vmem>>, vector<32x32xf32>
    %cst = arith.constant dense<0.000000e+00> : vector<8x32xf32>
    %4 = tpu.matmul %1, %3, %cst {dimension_numbers = #tpu.dot_dimension_numbers<[1], [0], [0], [1], [0, 0, 1, 1], [], []>} : vector<8x32xf32>, vector<32x32xf32>, vector<8x32xf32> -> vector<8x32xf32>
    %5 = vector.shape_cast %4 : vector<8x32xf32> to vector<1x8x32xf32>
    %cst_6 = arith.constant dense<0.000000e+00> : vector<1x8x8xf32>
    %6 = tpu.matmul %5, %2, %cst_6 {dimension_numbers = #tpu.dot_dimension_numbers<[2], [2], [1], [1], [0, 0, 0, 1, 1, 1], [0], [0]>} : vector<1x8x32xf32>, vector<1x8x32xf32>, vector<1x8x8xf32> -> vector<1x8x8xf32>
    %7 = tpu.iota {dimensions = array<i32: 2>} : vector<1x8x8xi32>
    %c0_i32 = arith.constant 0 : i32
    %8 = arith.addi %0, %c0_i32 : i32
    %9 = arith.index_cast %8 : i32 to index
    %10 = memref.load %arg1[%9] : memref<2xi32, #tpu.memory_space<smem>>
    %11 = vector.broadcast %10 : i32 to vector<1x8x1xi32>
    %12 = vector.broadcast %11 : vector<1x8x1xi32> to vector<1x8x8xi32>
    %13 = arith.cmpi slt, %7, %12 : vector<1x8x8xi32>
    %cst_7 = arith.constant 0xFF800000 : f32
    %14 = vector.broadcast %cst_7 : f32 to vector<1x8x8xf32>
    %15 = arith.select %13, %6, %14 : vector<1x8x8xi1>, vector<1x8x8xf32>
    %cst_8 = arith.constant dense<0xFF800000> : vector<1x8xf32>
    %16 = vector.multi_reduction <maximumf>, %15, %cst_8 [2] : vector<1x8x8xf32> to vector<1x8xf32>
    %17 = vector.shape_cast %16 : vector<1x8xf32> to vector<1x8x1xf32>
    %18 = vector.broadcast %17 : vector<1x8x1xf32> to vector<1x8x8xf32>
    %19 = arith.subf %6, %18 : vector<1x8x8xf32>
    %20 = math.exp %19 : vector<1x8x8xf32>
    %cst_9 = arith.constant 0.000000e+00 : f32
    %21 = vector.broadcast %cst_9 : f32 to vector<1x8x8xf32>
    %22 = arith.select %13, %20, %21 : vector<1x8x8xi1>, vector<1x8x8xf32>
    %cst_10 = arith.constant dense<0.000000e+00> : vector<1x8xf32>
    %23 = vector.multi_reduction <add>, %22, %cst_10 [2] : vector<1x8x8xf32> to vector<1x8xf32>
    %24 = vector.shape_cast %23 : vector<1x8xf32> to vector<1x8x1xf32>
    %cst_11 = arith.constant 1.000000e-30 : f32
    %25 = vector.broadcast %cst_11 : f32 to vector<1x8x1xf32>
    %26 = arith.maximumf %24, %25 : vector<1x8x1xf32>
    %27 = tpu.reciprocal %26 : vector<1x8x1xf32> -> vector<1x8x1xf32>
    %cst_12 = arith.constant dense<0.000000e+00> : vector<1x8x32xf32>
    %28 = tpu.matmul %22, %2, %cst_12 {dimension_numbers = #tpu.dot_dimension_numbers<[2], [1], [1], [2], [0, 0, 0, 1, 1, 2], [0], [0]>} : vector<1x8x8xf32>, vector<1x8x32xf32>, vector<1x8x32xf32> -> vector<1x8x32xf32>
    %29 = vector.broadcast %27 : vector<1x8x1xf32> to vector<1x8x32xf32>
    %30 = arith.mulf %28, %29 : vector<1x8x32xf32>
    %31 = vector.shape_cast %30 : vector<1x8x32xf32> to vector<8x32xf32>
    %c0_13 = arith.constant 0 : index
    %c0_14 = arith.constant 0 : index
    %32 = vector.load %arg5[%c0_13, %c0_14] : memref<8x32xf32, #tpu.memory_space<vmem>>, vector<8x32xf32>
    tpu.vector_store %arg5[%c0_13, %c0_14], %31 {strides = array<i32>} : memref<8x32xf32, #tpu.memory_space<vmem>>, vector<8x32xf32>,
    return
  }
  func.func @transform_0(%arg0: i32, %arg1: memref<2xi32, #tpu.memory_space<smem>>) -> (i32, i32) {
    %c0_i32 = arith.constant 0 : i32
    %c0_i32_0 = arith.constant 0 : i32
    return %arg0, %c0_i32 : i32, i32
  }
  func.func @transform_1(%arg0: i32, %arg1: memref<2xi32, #tpu.memory_space<smem>>) -> (i32, i32, i32) {
    %c0_i32 = arith.constant 0 : i32
    %c0_i32_0 = arith.constant 0 : i32
    %c0_i32_1 = arith.constant 0 : i32
    return %arg0, %c0_i32, %c0_i32_0 : i32, i32, i32
  }
  func.func @transform_2(%arg0: i32, %arg1: memref<2xi32, #tpu.memory_space<smem>>) -> (i32, i32) {
    %c0_i32 = arith.constant 0 : i32
    %c0_i32_0 = arith.constant 0 : i32
    %c0_i32_1 = arith.constant 0 : i32
    return %c0_i32, %c0_i32_0 : i32, i32
  }
  func.func @transform_3(%arg0: i32, %arg1: memref<2xi32, #tpu.memory_space<smem>>) -> (i32, i32) {
    %c0_i32 = arith.constant 0 : i32
    %c0_i32_0 = arith.constant 0 : i32
    return %arg0, %c0_i32 : i32, i32
  }
}

</mosaic_0001>

<bundles_post_ra>
// kernel: tpu_custom_call.1
= control target key start
LH: loop header
LB: loop body
LE: loop exit
PB: predicated region body
PF: predicated region fallthrough
CT: control target
= control target key end

     0   :  { %s1203_s0 = inlined_call_operand.hbm [shape: s32[2], index: 0, kind: input, shape index: {}]   ;;  %s1204_s1 = inlined_call_operand.hbm [shape: f32[16,32], index: 1, kind: input, shape index: {}]   ;;  %s1205_s2 = inlined_call_operand.hbm [shape: f32[2,8,32], index: 2, kind: input, shape index: {}]   ;;  %s1206_s3 = inlined_call_operand.hbm [shape: f32[32,32], index: 3, kind: input, shape index: {}]   ;;  %s1207_s4 = inlined_call_operand.hbm [shape: f32[16,32], index: 4, kind: output, shape index: {}]  }
   0x1   :  { %s737_s17 = scalar_lea.hbm %s1203_s0, 16 }
   0x2   :  { %p738_p0 = scmp.ne.s32.totalorder %s1203_s0, %s737_s17  ;;  %p741_p1 = scmp.lt.u32.totalorder %s737_s17, %s1203_s0 }
   0x4   :  { %p743_p2 = pnand %p741_p1, %p738_p0 }
   0x6   :  { %746 = shalt.err (!%p743_p2)  }
   0x7   :  { %s913_s22 = smov [#allocation3]  }
   0x8   :  { %10 = dma.hbm_to_smem %s1203_s0, 16, %s913_s22, [#allocation2] }
   0x9   :  { %879 = dma.done.wait [#allocation2], 16 }
   0xa   :  { %880 = vsyncadd [#allocation2], 4294967280 }
   0xb   :  { %12 = sfence }
   0xc   :  { %13 = vsyncpa [#allocation5], 0 }
   0xd   :  { %15 = vsyncpa [#allocation5 + $0x1], 0 }
   0xe   :  { %16 = vsyncpa [#allocation8], 0 }
   0xf   :  { %18 = vsyncpa [#allocation8 + $0x1], 0 }
  0x10   :  { %19 = vsyncpa [#allocation6], 0 }
  0x11   :  { %21 = vsyncpa [#allocation6 + $0x1], 0  ;;  %s960_s25 = smov 0   ;;  %s962_s26 = smov 0  }
  0x12   :  { %s964_s27 = smov 0   ;;  %s966_s28 = smov 0  }
  0x13 LB: > { %s981_s0 = sadd.s32 4294967295, %s911_s28   ;;  %s608_s29 = sadd.s32 4294967294, %s911_s28   ;;  %s911_s28 = sphi %s966_s28, %s1229_s28   ;;  %s907_s27 = sphi %s964_s27, %s1228_s27   ;;  %s903_s26 = sphi %s962_s26, %s1227_s26   ;;  %s899_s25 = sphi %s960_s25, %s1226_s25  }
  0x14   : > { %p47_p3 = scmp.ne.s32.totalorder %s903_s26, %s899_s25  ;;  %p1208_p4 = scmp.eq.s32.totalorder %s981_s0, 0 }
  0x15   : > { %p124_p6 = scmp.eq.s32.totalorder %s608_s29, 1  ;;  %p609_p8 = scmp.ge.s32.totalorder %s911_s28, 1 }
  0x16   : > { %p990_p7 = por %p1208_p4, %p47_p3  ;;  %p131_p10 = scmp.lt.s32.totalorder %s911_s28, 3 }
  0x17   : > { %p995_p9 = por %p124_p6, %p47_p3  ;;  %s914_s7 = smov [#allocation9]  }
  0x18   : > { %s1212_s30 = scalar_select %p990_p7, 1, 0 }
  0x19   : > { %s1213_s5 = scalar_select %p995_p9, 1, 0 }
  0x1a   : > { %p1000_p11 = pnand %p609_p8, %p131_p10  ;;  %s143_s8 = sshll.u32 %s914_s7, 4  ;;  %s1004_s8 = int_to_ptr.vmem [resolvable:$true] %s143_s8 }
  0x1b   : > { %s1016_s10 = sadd.s32 1, %s911_s28   ;;  %s34_s11 = sadd.s32 1, %s907_s27 }
  0x1c   : > { %s1214_s6 = scalar_select %p1000_p11, 1, 0 }
  0x1d   : > { %p675_p12 = pneg %p1000_p11  ;;  %s31_s12 = ssub.s32 %s911_s28, %s1016_s10 }
  0x1e   : > { %s747_s15 = scalar_lea.hbm %s1206_s3, 512 }
  0x1f   : > { %p1011_p0 = pnand %p675_p12, %p1208_p4  ;;  %p748_p1 = scmp.ne.s32.totalorder %s1206_s3, %s747_s15 }
  0x20   : > { %p754_p8 = scmp.lt.u32.totalorder %s747_s15, %s1206_s3 }
  0x21   : > { %p749_p2 = pneg %p1011_p0 }
  0x23   : > { %p750_p3 = pnand %p749_p2, %p748_p1 }
  0x25   : > { %p751_p6 = pneg %p750_p3 }
  0x27   : > { %p756_p10 = pnand %p754_p8, %p751_p6 }
  0x29   : > { %759 = shalt.err (!%p756_p10)
}
  0x2a   : > { %s760_s20 = scalar_lea.vmem %s1004_s8, 512  ;;  %p768_p5 = scmp.lt.s32.totalorder %s1004_s8, %s1004_s8 }
  0x2b   : > { %p761_p12 = scmp.ne.s32.totalorder %s1004_s8, %s760_s20  ;;  %p769_p9 = scmp.lt.s32.totalorder %s760_s20, %s760_s20 }
  0x2d   : > { %p763_p13 = pnand %p761_p12, %p749_p2  ;;  %p770_p7 = por %p769_p9, %p768_p5 }
  0x2f   : > { %p764_p4 = pneg %p763_p13 }
  0x31   : > { %p771_p11 = pnand %p770_p7, %p764_p4 }
  0x33   : > { %774 = shalt.err (!%p771_p11)
}
  0x34   : > { %s915_s21 = smov 128   ;;  %s916_s22 = smov 8  }
  0x35   : > { %678 = dma.hbm_to_vmem [thread:$0]  (!%p1011_p0), %s1206_s3, 512, %s1004_s8, [#allocation8], %s915_s21, %s915_s21, %s916_s22  }
  0x36   : > { %p32_p5 = scmp.eq.s32.totalorder %s31_s12, 0  ;;  %p41_p4 = scmp.ne.s32.totalorder %s907_s27, %s903_s26 }
  0x37   : > { %p42_p7 = scmp.eq.s32.totalorder %s911_s28, 0  ;;  %p691_p9 = scmp.lt.s32.totalorder %s911_s28, 2 }
  0x38   : > { %s1047_s29 = scalar_select %p32_p5, %s907_s27, %s34_s11  }
  0x39   : > { %p43_p11 = por %p42_p7, %p41_p4  ;;  %p1216_p13 = scmp.eq.s32.totalorder %s981_s0, 1 }
  0x3a   : > { %s157_s13 = sand.u32 1, %s907_s27   ;;  %s613_s14 = sshll.u32 %s911_s28, 7 }
  0x3b   : > { %p1051_p1 = por %p1216_p13, %p41_p4  ;;  %s1057_s15 = sshll.u32 %s157_s13, 3 }
  0x3c   : > { %s1062_s8 = scalar_lea.hbm %s1204_s1, %s613_s14  ;;  %s161_s11 = scalar_lea.vmem [#allocation4], %s1057_s15 }
  0x3d   : > { %s1217_s7 = scalar_select %p1051_p1, 1, 0 }
  0x3e   : > { %s168_s12 = sshll.u32 %s161_s11, 4  ;;  %p1065_p0 = pnand %p691_p9, %p43_p11  ;;  %s1069_s12 = int_to_ptr.vmem [resolvable:$true] %s168_s12 }
  0x3f   : > { %s1074_s20 = scalar_lea.hbm %s1205_s2, %s613_s14  ;;  %s158_s21 = scalar_lea.sflag [#allocation5], %s157_s13 }
  0x40   : > { %s775_s22 = scalar_lea.hbm %s1062_s8, 128  ;;  %p777_p3 = pneg %p1065_p0 }
  0x41   : > { %p776_p2 = scmp.ne.s32.totalorder %s1062_s8, %s775_s22  ;;  %s780_s9 = scalar_lea.hbm %s1204_s1, 256 }
  0x42   : > { %p781_p10 = scmp.lt.u32.totalorder %s1062_s8, %s1204_s1  ;;  %p782_p12 = scmp.lt.u32.totalorder %s780_s9, %s775_s22 }
  0x43   : > { %p778_p6 = pnand %p777_p3, %p776_p2  ;;  %p784_p4 = scmp.lt.u32.totalorder %s775_s22, %s1062_s8 }
  0x44   : > { %p783_p5 = por %p782_p12, %p781_p10 }
  0x45   : > { %p779_p8 = pneg %p778_p6 }
  0x46   : > { %p785_p7 = por %p784_p4, %p783_p5 }
  0x48   : > { %p786_p9 = pnand %p785_p7, %p779_p8 }
  0x4a   : > { %789 = shalt.err (!%p786_p9)
}
  0x4b   : > { %s790_s13 = scalar_lea.vmem %s1069_s12, 128  ;;  %s917_s14 = smov [#allocation4]  }
  0x4c   : > { %p791_p11 = scmp.ne.s32.totalorder %s1069_s12, %s790_s13  ;;  %s795_s18 = sshll.u32 %s917_s14, 4  ;;  %s796_s18 = int_to_ptr.vmem [resolvable:$false] %s795_s18 }
  0x4d   : > { %s797_s19 = scalar_lea.vmem %s796_s18, 256  ;;  %p798_p6 = scmp.lt.s32.totalorder %s1069_s12, %s796_s18 }
  0x4e   : > { %p793_p13 = pnand %p791_p11, %p777_p3  ;;  %p799_p10 = scmp.lt.s32.totalorder %s797_s19, %s790_s13 }
  0x50   : > { %p794_p2 = pneg %p793_p13  ;;  %p800_p12 = por %p799_p10, %p798_p6 }
  0x52   : > { %p801_p5 = pnand %p800_p12, %p794_p2 }
  0x54   : > { %804 = shalt.err (!%p801_p5)
}
  0x55   : > { %682 = dma.hbm_to_vmem [thread:$0]  (!%p1065_p0), %s1062_s8, 128, %s1069_s12, %s158_s21  }
  0x56   : > { %s175_s22 = sand.u32 1, %s911_s28   ;;  %s179_s23 = scalar_lea.vmem [#allocation7], %s1057_s15 }
  0x57   : > { %s186_s24 = sshll.u32 %s179_s23, 4  ;;  %s176_s9 = scalar_lea.sflag [#allocation8], %s175_s22  ;;  %s187_s24 = int_to_ptr.vmem [resolvable:$true] %s186_s24 }
  0x58   : > { %s805_s16 = scalar_lea.hbm %s1074_s20, 128  ;;  %s810_s14 = scalar_lea.hbm %s1205_s2, 256 }
  0x59   : > { %p806_p8 = scmp.ne.s32.totalorder %s1074_s20, %s805_s16  ;;  %p811_p9 = scmp.lt.u32.totalorder %s1074_s20, %s1205_s2 }
  0x5a   : > { %p812_p11 = scmp.lt.u32.totalorder %s810_s14, %s805_s16  ;;  %p814_p2 = scmp.lt.u32.totalorder %s805_s16, %s1074_s20 }
  0x5b   : > { %p808_p4 = pnand %p806_p8, %p777_p3 }
  0x5c   : > { %p813_p13 = por %p812_p11, %p811_p9 }
  0x5d   : > { %p809_p7 = pneg %p808_p4 }
  0x5e   : > { %p815_p6 = por %p814_p2, %p813_p13 }
  0x60   : > { %p816_p10 = pnand %p815_p6, %p809_p7 }
  0x62   : > { %819 = shalt.err (!%p816_p10)
}
  0x63   : > { %s820_s15 = scalar_lea.vmem %s187_s24, 128  ;;  %s918_s8 = smov [#allocation7]  }
  0x64   : > { %p821_p12 = scmp.ne.s32.totalorder %s187_s24, %s820_s15  ;;  %s825_s12 = sshll.u32 %s918_s8, 4  ;;  %s826_s12 = int_to_ptr.vmem [resolvable:$false] %s825_s12 }
  0x65   : > { %s827_s21 = scalar_lea.vmem %s826_s12, 256  ;;  %p828_p4 = scmp.lt.s32.totalorder %s187_s24, %s826_s12 }
  0x66   : > { %p823_p5 = pnand %p821_p12, %p777_p3  ;;  %p829_p1 = scmp.lt.s32.totalorder %s827_s21, %s820_s15 }
  0x68   : > { %p824_p8 = pneg %p823_p5  ;;  %p830_p9 = por %p829_p1, %p828_p4 }
  0x6a   : > { %p831_p11 = pnand %p830_p9, %p824_p8 }
  0x6c   : > { %834 = shalt.err (!%p831_p11)
}
  0x6d   : > { %685 = dma.hbm_to_vmem [thread:$0]  (!%p1065_p0), %s1074_s20, 128, %s187_s24, %s176_s9  }
  0x6e   : > { %p1219_p7 = scmp.ne.s32.totalorder %s1214_s6, 0 }
  0x6f   : > { %s1125_s22 = sand.u32 (!%p1219_p7), 1, %s903_s26   ;;  %p1220_p1 = scmp.ne.s32.totalorder (!%p1219_p7), %s1212_s30, 0 }
  0x70   : > { %195 = sbr.rel (%p1219_p7) target bundleno = 948 (0x3b4), region = 32  ;;  %s1128_s23 = sshll.u32 (!%p1219_p7), %s1125_s22, 3 }
  0x71   : > { %s198_s16 = scalar_lea.sflag (!%p1219_p7), [#allocation5], %s1125_s22  ;;  %s201_s11 = scalar_lea.vmem (!%p1219_p7), [#allocation4], %s1128_s23 }
  0x77   : > { %882 = dma.done.wait (%p1220_p1), %s198_s16, 128  }
  0x78   : > { %884 = vsyncadd (%p1220_p1), %s198_s16, 4294967168  ;;  %s206_s6 = sand.u32 1, %s981_s0   ;;  %s210_s20 = scalar_lea.vmem [#allocation7], %s1128_s23 }
  0x79   : > { %s207_s17 = scalar_lea.sflag [#allocation8], %s206_s6 }
  0x7a   : > { %886 = dma.done.wait (%p1220_p1), %s207_s17, 128  }
  0x7b   : > { %888 = vsyncadd (%p1220_p1), %s207_s17, 4294967168  ;;  %p1221_p0 = scmp.eq.s32.totalorder %s981_s0, 0 }
  0x7d   : > { %890 = dma.done.wait (%p1221_p0), [#allocation8], 512   ;;  %p1222_p3 = pmov %p1221_p0 }
  0x7e   : > { %v919_v0 = vmov 0.0|0.0   ;;  %vm920_vm0 = vmmov 0   ;;  %v921_v1 = vmov 0.0   ;;  %v244_v2 = vld [vmem:[#allocation9] sm:$0xff]  ;;  %v245_v3 = vld [vmem:[#allocation9 + $0x8] sm:$0xff]  ;;  %v246_v4 = vld [vmem:[#allocation9 + $0x10] sm:$0xff]  ;;  %v398_v12 = vlaneseq }
  0x7f   : > { %892 = vsyncadd (%p1222_p3), [#allocation8], 4294966784  ;;  %659 = vmatprep.subr.bf16.mxu0 %v919_v0  ;;  %646 = vmatprep.mubr.msk.f32.mxu0 %vm920_vm0, %v921_v1  ;;  %v660_v5 = vpack.c.bf16 %v245_v3, %v244_v2  ;;  %v247_v6 = vld [vmem:[#allocation9 + $0x18] sm:$0xff]  ;;  %vm248_vm1 = vcmask 261120   ;;  %v242_v9 = vld [vmem:[%s201_s11] sm:$0xff]  ;;  %s400_s30 = sld [smem:[#allocation3 + %s981_s0]] }
  0x80   : > { %649 = vmatprep.subr.mxu1 %v921_v1  ;;  %651 = vmatprep.mubr.msk.f32.mxu1 %vm920_vm0, %v921_v1  ;;  %v243_v7 = vld [vmem:[%s210_s20] sm:$0xff]  ;;  %v663_v8 = vpack.c.bf16 %v247_v6, %v246_v4  ;;  %v399_v13 = vand.u32 127, %v398_v12  ;;  %vm404_vm3 = vcmask 64512   ;;  %s626_s24 = sshll.u32 %s981_s0, 7  ;;  %s241_s9 = scalar_lea.vmem [#allocation10], %s1128_s23 }
  0x81   : > { %650 = vmatpush3.xpose.msk.msra.mxu1 %vm248_vm1, %v243_v7  ;;  %661 = vmatpush3.bf16.msra.mxu0 %v660_v5  ;;  %s506_s13 = sshll.u32 %s241_s9, 4  ;;  %s1158_s19 = scalar_lea.hbm %s1207_s4, %s626_s24  ;;  %s1160_s13 = int_to_ptr.vmem [resolvable:$true] %s506_s13 }
  0x82   : > { %654 = vmatprep.subr.mxu1 %v921_v1  ;;  %662 = vmatprep.subr.bf16.mxu0 %v919_v0  ;;  %s493_s15 = scalar_lea.sflag [#allocation6], %s1125_s22  ;;  %s835_s0 = scalar_lea.vmem %s1160_s13, 128 }
  0x83   : > { %p836_p13 = scmp.ne.s32.totalorder %s1160_s13, %s835_s0  ;;  %p1223_p2 = scmp.ne.s32.totalorder %s1217_s7, 0 }
  0x84   : > { %s922_s8 = smov [#allocation10]  }
  0x85   : > { %664 = vmatpush3.bf16.msra.mxu0 %v663_v8  ;;  %v401_v14 = vstv %s400_s30  ;;  %p837_p6 = pnand %p836_p13, %p1223_p2  ;;  %s839_s12 = sshll.u32 %s922_s8, 4  ;;  %s840_s12 = int_to_ptr.vmem [resolvable:$false] %s839_s12 }
  0x86   : > { %vm402_vm2 = vcmp.lt.s32.totalorder %v399_v13, %v401_v14  ;;  %s841_s21 = scalar_lea.vmem %s840_s12, 256  ;;  %p842_p12 = scmp.lt.s32.totalorder %s1160_s13, %s840_s12 }
  0x87   : > { %p838_p10 = pneg %p837_p6  ;;  %p843_p5 = scmp.lt.s32.totalorder %s841_s21, %s835_s0 }
  0x88   : > { %647 = vmatmul.mubr.msk.f32.vlgmr.msra.gmra.mrb[0].mxu0 %vm248_vm1, %v242_v9 }
  0x89   : > { %p844_p8 = por %p843_p5, %p842_p12 }
  0x8b   : > { %p845_p4 = pnand %p844_p8, %p838_p10 }
 0x15b   : > { %v318_v10 = vpop.f32.mrb[0].mxu0 }
 0x15c   : > { %v648_v11 = vpop.f32.mrb[1].mxu0  ;;  %652 = vmatmul.mubr.msk.f32.vlgmr.msra.gmra.mrb[0].mxu1 %vm248_vm1, %v318_v10 }
 0x15d   : > { %655 = vmatpush3.msra.mxu1 %v243_v7  ;;  %656 = vmatprep.mubr.msk.f32.mxu1 %vm920_vm0, %v921_v1 }
 0x22f   : > { %v394_v15 = vpop.f32.mrb[0].mxu1 }
 0x230   : > { %v653_v16 = vpop.f32.mrb[1].mxu1  ;;  %v403_v17 = vsel %vm402_vm2, %v394_v15, -inf }
 0x231   : > { %v405_v18 = vsel %vm404_vm3, %v403_v17, -inf }
 0x232   : > { %406 = vmax.xlane.f32.xlu0 %v405_v18 }
 0x2bf   : > { %v407_v19 = vpop.xlane.xlu0 %406 }
 0x2c0   : > { %v408_v20 = vsub.f32 %v394_v15, %v407_v19 }
 0x2c2   : > { %v409_v21 = vmul.f32 1.442695, %v408_v20 }
 0x2c4   : > { %733 = vpow2.f32 %v409_v21 }
 0x2ce   : > { %v734_v22 = vpop.eup %733 }
 0x2cf   : > { %v411_v23 = vsel %vm402_vm2, %v734_v22, 0.0 }
 0x2d0   : > { %657 = vmatmul.mubr.msk.f32.vlgmr.msra.gmra.mrb[2].mxu1 %vm404_vm3, %v411_v23  ;;  %v412_v24 = vsel %vm404_vm3, %v411_v23, 0.0 }
 0x2d1   : > { %413 = vadd.xlane.f32.xlu0 %v412_v24 }
 0x35e   : > { %v414_v25 = vpop.xlane.xlu0 %413 }
 0x35f   : > { %v415_v26 = vmax.f32 %v414_v25, 1e-30 }
 0x361   : > { %735 = vrcp.f32 %v415_v26 }
 0x36b   : > { %v736_v27 = vpop.eup %735 }
 0x3a3   : > { %v486_v28 = vpop.f32.mrb[2].mxu1 }
 0x3a4   : > { %v490_v29 = vmul.f32 %v736_v27, %v486_v28  ;;  %v658_v30 = vpop.f32.mrb[3].mxu1 }
 0x3a6   : > { %491 = vst.msk [vmem:[%s241_s9] sm:$0xff] %vm248_vm1, %v490_v29 }
 0x3a7   : > { %848 = shalt.err (!%p845_p4)
}
 0x3a8   : > { %s849_s22 = scalar_lea.hbm %s1158_s19, 128  ;;  %s853_s11 = scalar_lea.hbm %s1207_s4, 256 }
 0x3a9   : > { %p850_p9 = scmp.ne.s32.totalorder %s1158_s19, %s849_s22  ;;  %p854_p1 = scmp.lt.u32.totalorder %s1158_s19, %s1207_s4 }
 0x3aa   : > { %p855_p0 = scmp.lt.u32.totalorder %s853_s11, %s849_s22  ;;  %p857_p13 = scmp.lt.u32.totalorder %s849_s22, %s1158_s19 }
 0x3ab   : > { %p851_p11 = pnand %p850_p9, %p1223_p2 }
 0x3ac   : > { %p856_p3 = por %p855_p0, %p854_p1 }
 0x3ad   : > { %p852_p7 = pneg %p851_p11 }
 0x3ae   : > { %p858_p6 = por %p857_p13, %p856_p3 }
 0x3b0   : > { %p859_p10 = pnand %p858_p6, %p852_p7 }
 0x3b2   : > { %862 = shalt.err (!%p859_p10)
}
 0x3b3   : > { %673 = dma.vmem_to_hbm [thread:$0]  (%p1223_p2), %s1160_s13, 128, %s1158_s19, %s493_s15  }
 0x3b4 PF: > { %s518_s20 = sand.u32 1, %s899_s25   ;;  %p1224_p12 = scmp.ne.s32.totalorder %s1213_s5, 0 }
 0x3b5   : > { %p1225_p5 = scmp.ge.s32.totalorder %s911_s28, 2  ;;  %s519_s30 = scalar_lea.sflag [#allocation6], %s518_s20 }
 0x3b7   : > { %p687_p8 = pnand %p1225_p5, %p1224_p12 }
 0x3b9   : > { %894 = dma.done.wait (!%p687_p8), %s519_s30, 128  }
 0x3ba   : > { %896 = vsyncadd (!%p687_p8), %s519_s30, 4294967168  ;;  %p24_p4 = scmp.ge.s32.totalorder %s1016_s10, 4   ;;  %s1226_s25 = smov %s903_s26 }
 0x3bb   : > { %s1227_s26 = smov %s907_s27  ;;  %s1228_s27 = smov %s1047_s29 }
 0x3bc   : > { %s1229_s28 = smov %s1016_s10  ;;  %26 = sbr.rel (!%p24_p4) target bundleno = 19 (0x13), region = 94 }
 0x3c3   :  { %524 = vsyncpa [#allocation5], 1 }
 0x3c4   :  { %526 = vsyncpa [#allocation5 + $0x1], 1 }
 0x3c5   :  { %527 = vsyncpa [#allocation8], 1 }
 0x3c6   :  { %529 = vsyncpa [#allocation8 + $0x1], 1 }
 0x3c7   :  { %530 = vsyncpa [#allocation6], 1 }
 0x3c8   :  { %532 = vsyncpa [#allocation6 + $0x1], 1 }

</bundles_post_ra>
